<compile_context>
chip_gen: v6e
topology: v6e:2x2x1
jax: 0.10.0
libtpu: 0.0.40
codegen_flags: <defaults>
</compile_context>

<pallas_src>
import math
import functools

import jax
import jax.numpy as jnp
from jax.experimental import pallas as pl
from jax.experimental.pallas import tpu as pltpu


def _layernorm(y, gamma, beta, eps):
    mu = jnp.mean(y, axis=-1, keepdims=True)
    var = jnp.mean(jnp.square(y - mu), axis=-1, keepdims=True)
    return (y - mu) * jax.lax.rsqrt(var + eps) * gamma + beta


# ---------------------------------------------------------------------------
# Pass 1: K/V projection, row-tiled, once per token.
# Output layout: [B, nhead, S, hd] in bf16 (head-major so pass 2 never lane-slices
# the streamed operand).
# ---------------------------------------------------------------------------
def _kv_proj_kernel(x_ref, wkv_ref, bkv_ref, k_ref, v_ref, *, nhead, head_dim):
    E = x_ref.shape[2]
    x = x_ref[0].astype(jnp.bfloat16)                                   # [tr, E]
    kv = (jnp.dot(x, wkv_ref[...], preferred_element_type=jnp.float32)
          + bkv_ref[...]).astype(jnp.bfloat16)                          # [tr, 2E]
    for h in range(nhead):                                              # static, once per row tile
        k_ref[0, h] = kv[:, h * head_dim:(h + 1) * head_dim]
        v_ref[0, h] = kv[:, E + h * head_dim:E + (h + 1) * head_dim]


def _make_kv_proj_call(B, S, E, nhead, tr):
    hd = E // nhead
    flops = 4 * B * S * E * E                       # x @ [E, 2E]
    bytes_accessed = B * S * E * 4 + 2 * B * S * E * 2 + 2 * E * E * 2
    return pl.pallas_call(
        functools.partial(_kv_proj_kernel, nhead=nhead, head_dim=hd),
        out_shape=(jax.ShapeDtypeStruct((B, nhead, S, hd), jnp.bfloat16),
                   jax.ShapeDtypeStruct((B, nhead, S, hd), jnp.bfloat16)),
        grid=(B, S // tr),
        in_specs=[
            pl.BlockSpec((1, tr, E), lambda b, r: (b, r, 0)),           # tokens (row tile)
            pl.BlockSpec((E, 2 * E), lambda b, r: (0, 0)),              # Wk|Wv
            pl.BlockSpec((1, 2 * E), lambda b, r: (0, 0)),              # bk|bv
        ],
        out_specs=(
            pl.BlockSpec((1, nhead, tr, hd), lambda b, r: (b, 0, r, 0)),
            pl.BlockSpec((1, nhead, tr, hd), lambda b, r: (b, 0, r, 0)),
        ),
        compiler_params=pltpu.CompilerParams(
            dimension_semantics=("parallel", "parallel")),
        cost_estimate=pl.CostEstimate(flops=flops, transcendentals=0,
                                      bytes_accessed=bytes_accessed),
    )


# ---------------------------------------------------------------------------
# Pass 2: fused flash attention + output projection + LN1 + FFN + LN2.
# grid = (B, S//tq, S//tk); heads live inside the body (batched matmuls).
# ---------------------------------------------------------------------------
def _attn_ffn_kernel(xq_ref, k_ref, v_ref, mask_ref,
                     wq_ref, bq_ref, wo_ref, bo_ref,
                     g1_ref, be1_ref, w1_ref, b1_ref, w2_ref, b2_ref,
                     g2_ref, be2_ref,
                     o_ref,
                     q_sc, m_sc, l_sc, acc_sc,
                     *, nhead, head_dim, eps):
    ki = pl.program_id(2)
    num_k = pl.num_programs(2)

    # Start of this (b, q-tile)'s kv sweep: project Q once (full width N=E), reset state.
    @pl.when(ki == 0)
    def _init():
        xq = xq_ref[0].astype(jnp.bfloat16)                              # [tq, E]
        q = jnp.dot(xq, wq_ref[...], preferred_element_type=jnp.float32) + bq_ref[...]
        qb = (q * (1.0 / math.sqrt(head_dim))).astype(jnp.bfloat16)
        for h in range(nhead):                                           # static head split, once per q-tile
            q_sc[h] = qb[:, h * head_dim:(h + 1) * head_dim]
        m_sc[...] = jnp.full(m_sc.shape, -jnp.inf, jnp.float32)
        l_sc[...] = jnp.zeros(l_sc.shape, jnp.float32)
        acc_sc[...] = jnp.zeros(acc_sc.shape, jnp.float32)

    # Pure flash-attention inner step (no projections here): batched over heads.
    k = k_ref[0]                                                         # [nh, tk, hd] bf16
    v = v_ref[0]                                                         # [nh, tk, hd] bf16
    s = jnp.einsum('hqd,hkd->hqk', q_sc[...], k,
                   preferred_element_type=jnp.float32)                   # [nh, tq, tk]
    s = s + mask_ref[...]                                                # [1, 1, tk] broadcast
    m_prev = m_sc[...]
    m_new = jnp.maximum(m_prev, jnp.max(s, axis=-1, keepdims=True))
    alpha = jnp.exp(m_prev - m_new)
    p = jnp.exp(s - m_new)
    l_sc[...] = alpha * l_sc[...] + jnp.sum(p, axis=-1, keepdims=True)
    acc_sc[...] = alpha * acc_sc[...] + jnp.einsum(
        'hqk,hkd->hqd', p.astype(jnp.bfloat16), v,
        preferred_element_type=jnp.float32)                              # [nh, tq, hd]
    m_sc[...] = m_new

    # Last kv tile: normalize, output projection, residual + LN1 + FFN + residual + LN2.
    @pl.when(ki == num_k - 1)
    def _finalize():
        inv_l = pl.reciprocal(l_sc[...])                                 # exact; EUP slot
        attn = (acc_sc[...] * inv_l).astype(jnp.bfloat16)                # [nh, tq, hd]
        tq_, E_ = xq_ref.shape[1], xq_ref.shape[2]
        proj = jnp.zeros((tq_, E_), jnp.float32)
        for h in range(nhead):                                           # once per q-tile
            proj = proj + jnp.dot(attn[h], wo_ref[h],
                                  preferred_element_type=jnp.float32)
        x = xq_ref[0]                                                    # f32 residual
        y1 = x + proj + bo_ref[...]
        h_in = _layernorm(y1, g1_ref[...], be1_ref[...], eps)
        hid = jnp.dot(h_in.astype(jnp.bfloat16), w1_ref[...],
                      preferred_element_type=jnp.float32) + b1_ref[...]
        hid = jnp.maximum(hid, 0.0)                                      # ReLU
        ff = jnp.dot(hid.astype(jnp.bfloat16), w2_ref[...],
                     preferred_element_type=jnp.float32) + b2_ref[...]
        y2 = h_in + ff
        o_ref[0] = _layernorm(y2, g2_ref[...], be2_ref[...], eps).astype(o_ref.dtype)


def _pass2_vmem_limit_bytes(E, H, nhead, hd, tq, tk):
    """Derive a scoped-VMEM budget from actual residency (double-buffered blocks +
    grid-invariant weights + scratch) with headroom, instead of a hard-coded constant."""
    db = 2
    blocks = db * (tq * E * 4)                         # xq tile, f32
    blocks += db * 2 * (nhead * tk * hd * 2)           # K, V tiles, bf16
    blocks += db * (max(tk, 128) * 4)                  # mask tile
    blocks += db * (tq * E * 4)                        # output tile
    weights = db * (2 * E * E * 2 + E * H * 2 + H * E * 2)      # Wq, Wo, W1, W2 (bf16)
    weights += db * (8 * max(E, 128) * 4 + 2 * max(H, 128) * 4)  # biases / LN params
    scratch = (nhead * tq * hd * 2                      # q (bf16)
               + 2 * nhead * tq * 128 * 4               # m, l (lane-padded)
               + nhead * tq * hd * 4)                   # acc (f32)
    est = blocks + weights + scratch
    return int(min(128 * 1024 * 1024, max(32 * 1024 * 1024, int(est * 1.4))))


def _make_attn_ffn_call(B, S, E, nhead, tq, tk, out_dtype):
    hd = E // nhead
    H = E // 2
    grid = (B, S // tq, S // tk)

    def inv(shape):  # grid-invariant weights / biases / LN params (fetched once)
        return pl.BlockSpec(shape, lambda b, qi, ki, _n=len(shape): (0,) * _n)

    flops = (2 * B * S * E * E            # Q projection
             + 4 * B * S * S * E          # QK^T + PV
             + 2 * B * S * E * E          # output projection
             + 4 * B * S * E * H)         # FFN
    transcendentals = B * nhead * S * S
    bytes_accessed = (B * S * E * 4                       # tokens (q / residual path)
                      + 2 * B * S * E * 2 * (S // tq)     # K, V re-streamed per q-tile (bf16)
                      + B * S * E * 4                     # output
                      + 2 * E * E * 2 + 2 * E * H * 2)    # weights

    in_specs = [
        pl.BlockSpec((1, tq, E), lambda b, qi, ki: (b, qi, 0)),              # tokens (q tile)
        pl.BlockSpec((1, nhead, tk, hd), lambda b, qi, ki: (b, 0, ki, 0)),   # K (bf16, head-major)
        pl.BlockSpec((1, nhead, tk, hd), lambda b, qi, ki: (b, 0, ki, 0)),   # V
        pl.BlockSpec((1, 1, tk), lambda b, qi, ki: (b, 0, ki)),              # additive mask
        inv((E, E)), inv((1, E)),                                            # Wq, bq
        inv((nhead, hd, E)), inv((1, E)),                                    # Wo (per head), bo
        inv((1, E)), inv((1, E)),                                            # LN1 gamma/beta
        inv((E, H)), inv((1, H)),                                            # FFN W1, b1
        inv((H, E)), inv((1, E)),                                            # FFN W2, b2
        inv((1, E)), inv((1, E)),                                            # LN2 gamma/beta
    ]

    return pl.pallas_call(
        functools.partial(_attn_ffn_kernel, nhead=nhead, head_dim=hd, eps=1e-5),
        out_shape=jax.ShapeDtypeStruct((B, S, E), out_dtype),
        grid=grid,
        in_specs=in_specs,
        out_specs=pl.BlockSpec((1, tq, E), lambda b, qi, ki: (b, qi, 0)),
        scratch_shapes=[
            pltpu.VMEM((nhead, tq, hd), jnp.bfloat16),   # scaled Q, per head
            pltpu.VMEM((nhead, tq, 1), jnp.float32),     # running max
            pltpu.VMEM((nhead, tq, 1), jnp.float32),     # running sum
            pltpu.VMEM((nhead, tq, hd), jnp.float32),    # attention accumulator
        ],
        compiler_params=pltpu.CompilerParams(
            dimension_semantics=("parallel", "parallel", "arbitrary"),
            vmem_limit_bytes=_pass2_vmem_limit_bytes(E, H, nhead, hd, tq, tk),
        ),
        cost_estimate=pl.CostEstimate(flops=flops, transcendentals=transcendentals,
                                      bytes_accessed=bytes_accessed),
    )


# ---------------------------------------------------------------------------
# Python wrapper
# ---------------------------------------------------------------------------
def self_attention_layer(tokens, key_padding_mask, params, *, nhead,
                         block_q=256, block_k=256, block_rows=256):
    """tokens: [B, S, E] float32; key_padding_mask: [B, S] bool (True = pad)."""
    B, S, E = tokens.shape
    assert E % nhead == 0 and E % 2 == 0
    hd = E // nhead
    H = E // 2
    tq = min(block_q, S)
    tk = min(block_k, S)
    tr = min(block_rows, S)
    assert S % tq == 0 and S % tk == 0 and S % tr == 0

    # additive key-padding mask [B, 1, S] (f32); matches the reference softmax semantics
    mask_add = jnp.where(key_padding_mask, jnp.float32(-1e30),
                         jnp.float32(0.0)).reshape(B, 1, S)

    bf16 = jnp.bfloat16
    w_in = params["in_proj_weight"]             # [3E, E] (out, in)
    b_in = params["in_proj_bias"]               # [3E]
    wq = w_in[:E].T.astype(bf16)                # [E, E], output cols head-major
    bq = b_in[:E].reshape(1, E)
    wkv = jnp.concatenate([w_in[E:2 * E].T, w_in[2 * E:].T], axis=1).astype(bf16)   # [E, 2E]
    bkv = jnp.concatenate([b_in[E:2 * E], b_in[2 * E:]]).reshape(1, 2 * E)
    wo = params["out_proj_weight"].T.reshape(nhead, hd, E).astype(bf16)             # [nh, hd, E]
    bo = params["out_proj_bias"].reshape(1, E)
    g1 = params["ln1_gamma"].reshape(1, E)
    be1 = params["ln1_beta"].reshape(1, E)
    w1 = params["ffn_w1"].T.astype(bf16)        # [E, H]
    b1 = params["ffn_b1"].reshape(1, H)
    w2 = params["ffn_w2"].T.astype(bf16)        # [H, E]
    b2 = params["ffn_b2"].reshape(1, E)
    g2 = params["ln2_gamma"].reshape(1, E)
    be2 = params["ln2_beta"].reshape(1, E)

    # Pass 1: hoisted K/V projection (once per token), bf16 head-major output.
    k_proj, v_proj = _make_kv_proj_call(B, S, E, nhead, tr)(tokens, wkv, bkv)

    # Pass 2: fused flash attention + out proj + LN1 + FFN + LN2.
    return _make_attn_ffn_call(B, S, E, nhead, tq, tk, tokens.dtype)(
        tokens, k_proj, v_proj, mask_add,
        wq, bq, wo, bo, g1, be1, w1, b1, w2, b2, g2, be2)


# ---------------------------------------------------------------------------
# Pure-JAX reference (mirrors the PyTorch module in eval mode)
# ---------------------------------------------------------------------------
def _reference(tokens, masks, params, nhead):
    B, S, E = tokens.shape
    hd = E // nhead
    w_in, b_in = params["in_proj_weight"], params["in_proj_bias"]
    q = tokens @ w_in[:E].T + b_in[:E]
    k = tokens @ w_in[E:2 * E].T + b_in[E:2 * E]
    v = tokens @ w_in[2 * E:].T + b_in[2 * E:]
    q = q.reshape(B, S, nhead, hd).transpose(0, 2, 1, 3) / math.sqrt(hd)
    k = k.reshape(B, S, nhead, hd).transpose(0, 2, 1, 3)
    v = v.reshape(B, S, nhead, hd).transpose(0, 2, 1, 3)
    s = jnp.einsum('bhqd,bhkd->bhqk', q, k)
    s = s + jnp.where(masks, -1e30, 0.0)[:, None, None, :]
    p = jax.nn.softmax(s, axis=-1)
    a = jnp.einsum('bhqk,bhkd->bhqd', p, v).transpose(0, 2, 1, 3).reshape(B, S, E)
    proj = a @ params["out_proj_weight"].T + params["out_proj_bias"]

    def ln(x, g, b):
        mu = x.mean(-1, keepdims=True)
        var = ((x - mu) ** 2).mean(-1, keepdims=True)
        return (x - mu) / jnp.sqrt(var + 1e-5) * g + b

    x1 = ln(tokens + proj, params["ln1_gamma"], params["ln1_beta"])
    h = jnp.maximum(x1 @ params["ffn_w1"].T + params["ffn_b1"], 0.0)
    ff = h @ params["ffn_w2"].T + params["ffn_b2"]
    return ln(x1 + ff, params["ln2_gamma"], params["ln2_beta"])


# ---------------------------------------------------------------------------
# Deterministic parameter init (matches PyTorch module shapes)
# ---------------------------------------------------------------------------
def init_params(key, emb_size):
    hidden = emb_size // 2
    ks = jax.random.split(key, 8)
    be = 1.0 / math.sqrt(emb_size)
    bh = 1.0 / math.sqrt(hidden)
    u = lambda k, shape, bound: jax.random.uniform(k, shape, jnp.float32, -bound, bound)
    return {
        # nn.MultiheadAttention
        "in_proj_weight": u(ks[0], (3 * emb_size, emb_size), be),
        "in_proj_bias": u(ks[1], (3 * emb_size,), be),
        "out_proj_weight": u(ks[2], (emb_size, emb_size), be),
        "out_proj_bias": u(ks[3], (emb_size,), be),
        "ln1_gamma": jnp.ones((emb_size,), jnp.float32),
        "ln1_beta": jnp.zeros((emb_size,), jnp.float32),
        # PositionwiseFeedForward
        "ffn_w1": u(ks[4], (hidden, emb_size), be),
        "ffn_b1": u(ks[5], (hidden,), be),
        "ffn_w2": u(ks[6], (emb_size, hidden), bh),
        "ffn_b2": u(ks[7], (emb_size,), bh),
        "ln2_gamma": jnp.ones((emb_size,), jnp.float32),
        "ln2_beta": jnp.zeros((emb_size,), jnp.float32),
    }


if __name__ == "__main__":
    B, S, E, NHEAD = 2, 8, 32, 4

    key = jax.random.PRNGKey(0)
    k_tok, k_par = jax.random.split(key)
    tokens = jax.random.normal(k_tok, (B, S, E), jnp.float32)

    # key_padding_mask: True = padded. Batch 0 fully valid, batch 1 has last 2 keys padded.
    masks = jnp.zeros((B, S), dtype=bool).at[1, S - 2:].set(True)

    params = init_params(k_par, E)

    out = self_attention_layer(tokens, masks, params, nhead=NHEAD)
    out = jax.block_until_ready(out)

    ref = _reference(tokens, masks, params, NHEAD)
    max_err = float(jnp.max(jnp.abs(out - ref)))

    assert out.shape == (B, S, E)
    assert bool(jnp.all(jnp.isfinite(out)))
    # loose tolerance: kernel uses bf16 MXU operands, reference is full f32
    assert max_err < 1e-1, f"max abs err vs reference too large: {max_err}"
    print("KERNEL_OK")
</pallas_src>

<mosaic_0001>
module attributes {stable_mosaic.version = 11 : i64} {
  func.func @_kv_proj_kernel(%arg0: i32, %arg1: i32, %arg2: memref<1x8x32xf32, #tpu.memory_space<vmem>>, %arg3: memref<32x64xbf16, #tpu.memory_space<vmem>>, %arg4: memref<1x64xf32, #tpu.memory_space<vmem>>, %arg5: memref<1x4x8x8xbf16, #tpu.memory_space<vmem>>, %arg6: memref<1x4x8x8xbf16, #tpu.memory_space<vmem>>) attributes {dimension_semantics = [#tpu.dimension_semantics<parallel>, #tpu.dimension_semantics<parallel>], iteration_bounds = array<i64: 2, 1>, scalar_prefetch = 0 : i64, scratch_operands = 0 : i64, tpu.core_type = #tpu.core_type<tc>, window_params = [{transform_indices = @transform_0, window_bounds = array<i64: 1, 8, 32>}, {pipeline_mode = #tpu.pipeline_mode<synchronous>, transform_indices = @transform_1, window_bounds = array<i64: 32, 64>}, {pipeline_mode = #tpu.pipeline_mode<synchronous>, transform_indices = @transform_2, window_bounds = array<i64: 1, 64>}, {transform_indices = @transform_3, window_bounds = array<i64: 1, 4, 8, 8>}, {transform_indices = @transform_4, window_bounds = array<i64: 1, 4, 8, 8>}]} {
    %c0 = arith.constant 0 : index
    %c0_0 = arith.constant 0 : index
    %c0_1 = arith.constant 0 : index
    %0 = vector.load %arg2[%c0, %c0_0, %c0_1] : memref<1x8x32xf32, #tpu.memory_space<vmem>>, vector<1x8x32xf32>
    %1 = vector.shape_cast %0 : vector<1x8x32xf32> to vector<8x32xf32>
    %2 = arith.truncf %1 : vector<8x32xf32> to vector<8x32xbf16>
    %c0_2 = arith.constant 0 : index
    %c0_3 = arith.constant 0 : index
    %3 = vector.load %arg3[%c0_2, %c0_3] : memref<32x64xbf16, #tpu.memory_space<vmem>>, vector<32x64xbf16>
    %cst = arith.constant dense<0.000000e+00> : vector<8x64xf32>
    %4 = tpu.matmul %2, %3, %cst {dimension_numbers = #tpu.dot_dimension_numbers<[1], [0], [0], [1], [0, 0, 1, 1], [], []>} : vector<8x32xbf16>, vector<32x64xbf16>, vector<8x64xf32> -> vector<8x64xf32>
    %c0_4 = arith.constant 0 : index
    %c0_5 = arith.constant 0 : index
    %5 = vector.load %arg4[%c0_4, %c0_5] : memref<1x64xf32, #tpu.memory_space<vmem>>, vector<1x64xf32>
    %6 = vector.broadcast %5 : vector<1x64xf32> to vector<8x64xf32>
    %7 = arith.addf %4, %6 : vector<8x64xf32>
    %8 = arith.truncf %7 : vector<8x64xf32> to vector<8x64xbf16>
    %9 = vector.extract_strided_slice %8 {offsets = [0, 0], sizes = [8, 8], strides = [1, 1]} : vector<8x64xbf16> to vector<8x8xbf16>
    %c0_6 = arith.constant 0 : index
    %c0_7 = arith.constant 0 : index
    %c0_8 = arith.constant 0 : index
    %c0_9 = arith.constant 0 : index
    %10 = vector.load %arg5[%c0_6, %c0_7, %c0_8, %c0_9] : memref<1x4x8x8xbf16, #tpu.memory_space<vmem>>, vector<1x1x8x8xbf16>
    %11 = vector.shape_cast %10 : vector<1x1x8x8xbf16> to vector<8x8xbf16>
    %12 = vector.shape_cast %9 : vector<8x8xbf16> to vector<1x1x8x8xbf16>
    tpu.vector_store %arg5[%c0_6, %c0_7, %c0_8, %c0_9], %12 {strides = array<i32>} : memref<1x4x8x8xbf16, #tpu.memory_space<vmem>>, vector<1x1x8x8xbf16>,
    %13 = vector.extract_strided_slice %8 {offsets = [0, 32], sizes = [8, 8], strides = [1, 1]} : vector<8x64xbf16> to vector<8x8xbf16>
    %c0_10 = arith.constant 0 : index
    %c0_11 = arith.constant 0 : index
    %c0_12 = arith.constant 0 : index
    %c0_13 = arith.constant 0 : index
    %14 = vector.load %arg6[%c0_10, %c0_11, %c0_12, %c0_13] : memref<1x4x8x8xbf16, #tpu.memory_space<vmem>>, vector<1x1x8x8xbf16>
    %15 = vector.shape_cast %14 : vector<1x1x8x8xbf16> to vector<8x8xbf16>
    %16 = vector.shape_cast %13 : vector<8x8xbf16> to vector<1x1x8x8xbf16>
    tpu.vector_store %arg6[%c0_10, %c0_11, %c0_12, %c0_13], %16 {strides = array<i32>} : memref<1x4x8x8xbf16, #tpu.memory_space<vmem>>, vector<1x1x8x8xbf16>,
    %17 = vector.extract_strided_slice %8 {offsets = [0, 8], sizes = [8, 8], strides = [1, 1]} : vector<8x64xbf16> to vector<8x8xbf16>
    %c0_14 = arith.constant 0 : index
    %c1 = arith.constant 1 : index
    %c0_15 = arith.constant 0 : index
    %c0_16 = arith.constant 0 : index
    %18 = vector.load %arg5[%c0_14, %c1, %c0_15, %c0_16] : memref<1x4x8x8xbf16, #tpu.memory_space<vmem>>, vector<1x1x8x8xbf16>
    %19 = vector.shape_cast %18 : vector<1x1x8x8xbf16> to vector<8x8xbf16>
    %20 = vector.shape_cast %17 : vector<8x8xbf16> to vector<1x1x8x8xbf16>
    tpu.vector_store %arg5[%c0_14, %c1, %c0_15, %c0_16], %20 {strides = array<i32>} : memref<1x4x8x8xbf16, #tpu.memory_space<vmem>>, vector<1x1x8x8xbf16>,
    %21 = vector.extract_strided_slice %8 {offsets = [0, 40], sizes = [8, 8], strides = [1, 1]} : vector<8x64xbf16> to vector<8x8xbf16>
    %c0_17 = arith.constant 0 : index
    %c1_18 = arith.constant 1 : index
    %c0_19 = arith.constant 0 : index
    %c0_20 = arith.constant 0 : index
    %22 = vector.load %arg6[%c0_17, %c1_18, %c0_19, %c0_20] : memref<1x4x8x8xbf16, #tpu.memory_space<vmem>>, vector<1x1x8x8xbf16>
    %23 = vector.shape_cast %22 : vector<1x1x8x8xbf16> to vector<8x8xbf16>
    %24 = vector.shape_cast %21 : vector<8x8xbf16> to vector<1x1x8x8xbf16>
    tpu.vector_store %arg6[%c0_17, %c1_18, %c0_19, %c0_20], %24 {strides = array<i32>} : memref<1x4x8x8xbf16, #tpu.memory_space<vmem>>, vector<1x1x8x8xbf16>,
    %25 = vector.extract_strided_slice %8 {offsets = [0, 16], sizes = [8, 8], strides = [1, 1]} : vector<8x64xbf16> to vector<8x8xbf16>
    %c0_21 = arith.constant 0 : index
    %c2 = arith.constant 2 : index
    %c0_22 = arith.constant 0 : index
    %c0_23 = arith.constant 0 : index
    %26 = vector.load %arg5[%c0_21, %c2, %c0_22, %c0_23] : memref<1x4x8x8xbf16, #tpu.memory_space<vmem>>, vector<1x1x8x8xbf16>
    %27 = vector.shape_cast %26 : vector<1x1x8x8xbf16> to vector<8x8xbf16>
    %28 = vector.shape_cast %25 : vector<8x8xbf16> to vector<1x1x8x8xbf16>
    tpu.vector_store %arg5[%c0_21, %c2, %c0_22, %c0_23], %28 {strides = array<i32>} : memref<1x4x8x8xbf16, #tpu.memory_space<vmem>>, vector<1x1x8x8xbf16>,
    %29 = vector.extract_strided_slice %8 {offsets = [0, 48], sizes = [8, 8], strides = [1, 1]} : vector<8x64xbf16> to vector<8x8xbf16>
    %c0_24 = arith.constant 0 : index
    %c2_25 = arith.constant 2 : index
    %c0_26 = arith.constant 0 : index
    %c0_27 = arith.constant 0 : index
    %30 = vector.load %arg6[%c0_24, %c2_25, %c0_26, %c0_27] : memref<1x4x8x8xbf16, #tpu.memory_space<vmem>>, vector<1x1x8x8xbf16>
    %31 = vector.shape_cast %30 : vector<1x1x8x8xbf16> to vector<8x8xbf16>
    %32 = vector.shape_cast %29 : vector<8x8xbf16> to vector<1x1x8x8xbf16>
    tpu.vector_store %arg6[%c0_24, %c2_25, %c0_26, %c0_27], %32 {strides = array<i32>} : memref<1x4x8x8xbf16, #tpu.memory_space<vmem>>, vector<1x1x8x8xbf16>,
    %33 = vector.extract_strided_slice %8 {offsets = [0, 24], sizes = [8, 8], strides = [1, 1]} : vector<8x64xbf16> to vector<8x8xbf16>
    %c0_28 = arith.constant 0 : index
    %c3 = arith.constant 3 : index
    %c0_29 = arith.constant 0 : index
    %c0_30 = arith.constant 0 : index
    %34 = vector.load %arg5[%c0_28, %c3, %c0_29, %c0_30] : memref<1x4x8x8xbf16, #tpu.memory_space<vmem>>, vector<1x1x8x8xbf16>
    %35 = vector.shape_cast %34 : vector<1x1x8x8xbf16> to vector<8x8xbf16>
    %36 = vector.shape_cast %33 : vector<8x8xbf16> to vector<1x1x8x8xbf16>
    tpu.vector_store %arg5[%c0_28, %c3, %c0_29, %c0_30], %36 {strides = array<i32>} : memref<1x4x8x8xbf16, #tpu.memory_space<vmem>>, vector<1x1x8x8xbf16>,
    %37 = vector.extract_strided_slice %8 {offsets = [0, 56], sizes = [8, 8], strides = [1, 1]} : vector<8x64xbf16> to vector<8x8xbf16>
    %c0_31 = arith.constant 0 : index
    %c3_32 = arith.constant 3 : index
    %c0_33 = arith.constant 0 : index
    %c0_34 = arith.constant 0 : index
    %38 = vector.load %arg6[%c0_31, %c3_32, %c0_33, %c0_34] : memref<1x4x8x8xbf16, #tpu.memory_space<vmem>>, vector<1x1x8x8xbf16>
    %39 = vector.shape_cast %38 : vector<1x1x8x8xbf16> to vector<8x8xbf16>
    %40 = vector.shape_cast %37 : vector<8x8xbf16> to vector<1x1x8x8xbf16>
    tpu.vector_store %arg6[%c0_31, %c3_32, %c0_33, %c0_34], %40 {strides = array<i32>} : memref<1x4x8x8xbf16, #tpu.memory_space<vmem>>, vector<1x1x8x8xbf16>,
    return
  }
  func.func @transform_0(%arg0: i32, %arg1: i32) -> (i32, i32, i32) {
    %c0_i32 = arith.constant 0 : i32
    %c0_i32_0 = arith.constant 0 : i32
    return %arg0, %arg1, %c0_i32 : i32, i32, i32
  }
  func.func @transform_1(%arg0: i32, %arg1: i32) -> (i32, i32) {
    %c0_i32 = arith.constant 0 : i32
    %c0_i32_0 = arith.constant 0 : i32
    %c0_i32_1 = arith.constant 0 : i32
    return %c0_i32, %c0_i32_0 : i32, i32
  }
  func.func @transform_2(%arg0: i32, %arg1: i32) -> (i32, i32) {
    %c0_i32 = arith.constant 0 : i32
    %c0_i32_0 = arith.constant 0 : i32
    %c0_i32_1 = arith.constant 0 : i32
    return %c0_i32, %c0_i32_0 : i32, i32
  }
  func.func @transform_3(%arg0: i32, %arg1: i32) -> (i32, i32, i32, i32) {
    %c0_i32 = arith.constant 0 : i32
    %c0_i32_0 = arith.constant 0 : i32
    %c0_i32_1 = arith.constant 0 : i32
    return %arg0, %c0_i32, %arg1, %c0_i32_0 : i32, i32, i32, i32
  }
  func.func @transform_4(%arg0: i32, %arg1: i32) -> (i32, i32, i32, i32) {
    %c0_i32 = arith.constant 0 : i32
    %c0_i32_0 = arith.constant 0 : i32
    %c0_i32_1 = arith.constant 0 : i32
    return %arg0, %c0_i32, %arg1, %c0_i32_0 : i32, i32, i32, i32
  }
}

</mosaic_0001>

<bundles_post_ra>
// kernel: tpu_custom_call.1
= control target key start
LH: loop header
LB: loop body
LE: loop exit
PB: predicated region body
PF: predicated region fallthrough
CT: control target
= control target key end

     0   :  { %s1128_s0 = inlined_call_operand.hbm [shape: f32[2,8,32], index: 0, kind: input, shape index: {}]   ;;  %s1129_s1 = inlined_call_operand.hbm [shape: bf16[32,64], index: 1, kind: input, shape index: {}]   ;;  %s1130_s2 = inlined_call_operand.vmem [shape: f32[1,64], index: 2, kind: input, shape index: {}]   ;;  %s1131_s3 = inlined_call_operand.hbm [shape: bf16[2,4,8,8], index: 3, kind: output, shape index: {0}]   ;;  %s1132_s4 = inlined_call_operand.hbm [shape: bf16[2,4,8,8], index: 4, kind: output, shape index: {1}]  }
   0x1   :  { %1134 = sst [smem:[#allocation14_spill]] %s1129_s1 }
   0x2   :  { %10 = vsyncpa [#allocation3], 0 }
   0x3   :  { %12 = vsyncpa [#allocation3 + $0x1], 0 }
   0x4   :  { %13 = vsyncpa [#allocation6], 0 }
   0x5   :  { %14 = vsyncpa [#allocation4], 0 }
   0x6   :  { %16 = vsyncpa [#allocation4 + $0x1], 0 }
   0x7   :  { %17 = vsyncpa [#allocation9], 0 }
   0x8   :  { %19 = vsyncpa [#allocation9 + $0x1], 0  ;;  %s883_s15 = smov 0   ;;  %s885_s16 = smov 0  }
   0x9   :  { %s887_s17 = smov 0   ;;  %s889_s18 = smov 0  }
   0xa   :  { %s891_s19 = smov 0   ;;  %s893_s20 = smov 0  }
   0xb LB: > { %s533_s21 = sadd.s32 4294967295, %s839_s20   ;;  %s534_s22 = sadd.s32 4294967294, %s839_s20   ;;  %s839_s20 = sphi %s893_s20, %s25_s20   ;;  %s835_s19 = sphi %s891_s19, %s1152_s19   ;;  %s831_s18 = sphi %s889_s18, %s1151_s18   ;;  %s827_s17 = sphi %s887_s17, %s1150_s17   ;;  %s823_s16 = sphi %s885_s16, %s1149_s16   ;;  %s819_s15 = sphi %s883_s15, %s1148_s15  }
   0xc   : > { %p59_p0 = scmp.ne.s32.totalorder %s823_s16, %s819_s15  ;;  %p917_p1 = scmp.eq.s32.totalorder %s533_s21, 0 }
   0xd   : > { %p921_p2 = scmp.eq.s32.totalorder %s533_s21, 1  ;;  %p133_p3 = scmp.eq.s32.totalorder %s534_s22, 1 }
   0xe   : > { %p927_p4 = por %p917_p1, %p59_p0  ;;  %p535_p5 = scmp.ge.s32.totalorder %s839_s20, 1 }
   0xf   : > { %p932_p6 = por %p133_p3, %p59_p0  ;;  %p168_p7 = scmp.lt.s32.totalorder %s839_s20, 3 }
  0x10   : > { %s1137_s25 = scalar_select %p927_p4, 1, 0 }
  0x11   : > { %s1138_s26 = scalar_select %p932_p6, 1, 0 }
  0x12   : > { %p937_p8 = pnand %p535_p5, %p168_p7  ;;  %s841_s28 = smov [#allocation5]  }
  0x13   : > { %s180_s29 = sshll.u32 %s841_s28, 4  ;;  %s37_s5 = sadd.s32 1, %s835_s19  ;;  %s181_s29 = int_to_ptr.vmem [resolvable:$true] %s180_s29 }
  0x14   : > { %p588_p9 = pneg %p937_p8  ;;  %s682_s6 = scalar_lea.vmem %s181_s29, 256 }
  0x15   : > { %p683_p13 = scmp.ne.s32.totalorder %s181_s29, %s682_s6  ;;  %p690_p5 = scmp.lt.s32.totalorder %s181_s29, %s181_s29 }
  0x16   : > { %p946_p11 = pnand %p588_p9, %p917_p1  ;;  %p691_p7 = scmp.lt.s32.totalorder %s682_s6, %s682_s6 }
  0x18   : > { %p673_p12 = pneg %p946_p11  ;;  %p692_p6 = por %p691_p7, %p690_p5 }
  0x1a   : > { %p685_p0 = pnand %p683_p13, %p673_p12 }
  0x1c   : > { %p686_p3 = pneg %p685_p0 }
  0x1e   : > { %p693_p4 = pnand %p692_p6, %p686_p3 }
  0x20   : > { %696 = shalt.err (!%p693_p4)
}
  0x21   : > { %s842_s7 = smov 64   ;;  %s843_s8 = smov 4  }
  0x22   : > { %s1141_s1 = sld [smem:[#allocation14_spill]]  ;;  %p39_p6 = scmp.ge.s32.totalorder %s37_s5, 2 }
  0x23   : > { %s46_s11 = sadd.s32 1, %s827_s17  ;;  %p53_p4 = scmp.ne.s32.totalorder %s827_s17, %s823_s16 }
  0x24   : > { %p54_p9 = scmp.eq.s32.totalorder %s839_s20, 0  ;;  %s1154_s5 = smov (%p39_p6, %s37_s5), 0 }
  0x25   : > { %p970_p13 = por %p921_p2, %p53_p4  ;;  %s41_s14 = ssub.s32 %s835_s19, %s1154_s5 }
  0x26   : > { %p964_p12 = por %p54_p9, %p53_p4  ;;  %p604_p0 = scmp.lt.s32.totalorder %s839_s20, 2 }
  0x27   : > { %s197_s21 = sand.u32 1, %s827_s17  }
  0x28   : > { %591 = dma.hbm_to_vmem [thread:$0]  (!%p946_p11), %s1141_s1, 256, %s181_s29, [#allocation6], %s842_s7, %s842_s7, %s843_s8  }
  0x29   : > { %p44_p11 = scmp.eq.s32.totalorder %s41_s14, 0  ;;  %s538_s22 = sshll.u32 %s197_s21, 3 }
  0x2a   : > { %s539_s29 = sshll.u32 %s835_s19, 7  ;;  %s201_s8 = scalar_lea.vmem [#allocation2], %s538_s22 }
  0x2b   : > { %s979_s28 = scalar_select %p44_p11, %s827_s17, %s46_s11  }
  0x2c   : > { %s207_s7 = scalar_lea.hbm %s1128_s0, %s539_s29  ;;  %s209_s9 = sshll.u32 %s201_s8, 4  ;;  %s210_s9 = int_to_ptr.vmem [resolvable:$true] %s209_s9 }
  0x2d   : > { %p987_p2 = pnand %p604_p0, %p964_p12  ;;  %s198_s10 = scalar_lea.sflag [#allocation3], %s197_s21 }
  0x2e   : > { %s710_s14 = scalar_lea.vmem %s210_s9, 128  ;;  %s844_s11 = smov [#allocation2]  }
  0x2f   : > { %p699_p3 = pneg %p987_p2  ;;  %p711_p5 = scmp.ne.s32.totalorder %s210_s9, %s710_s14 }
  0x30   : > { %s715_s1 = sshll.u32 %s844_s11, 4  ;;  %s716_s1 = int_to_ptr.vmem [resolvable:$false] %s715_s1 }
  0x31   : > { %p713_p7 = pnand %p711_p5, %p699_p3  ;;  %s717_s29 = scalar_lea.vmem %s716_s1, 256 }
  0x32   : > { %p718_p4 = scmp.lt.s32.totalorder %s210_s9, %s716_s1  ;;  %p719_p9 = scmp.lt.s32.totalorder %s717_s29, %s710_s14 }
  0x33   : > { %p714_p6 = pneg %p713_p7 }
  0x34   : > { %p720_p11 = por %p719_p9, %p718_p4 }
  0x36   : > { %p721_p10 = pnand %p720_p11, %p714_p6 }
  0x38   : > { %724 = shalt.err (!%p721_p10)
}
  0x39   : > { %595 = dma.hbm_to_vmem [thread:$0]  (!%p987_p2), %s207_s7, 128, %s210_s9, %s198_s10  }
  0x3a   : > { %218 = sbr.rel (%p937_p8) target bundleno = 431 (0x1af), region = 32  ;;  %s998_s12 = sand.u32 (!%p937_p8), 1, %s823_s16  }
  0x3b   : > { %s541_s21 = sshll.u32 (!%p937_p8), %s998_s12, 3  ;;  %s221_s22 = scalar_lea.sflag (!%p937_p8), [#allocation3], %s998_s12 }
  0x3c   : > { %s224_s30 = scalar_lea.vmem (!%p937_p8), [#allocation2], %s541_s21  ;;  %p1145_p12 = scmp.ne.s32.totalorder (!%p937_p8), %s1137_s25, 0 }
  0x3f   : > { %802 = dma.done.wait (%p1145_p12), %s221_s22, 128  }
  0x40   : > { %804 = vsyncadd (%p1145_p12), %s221_s22, 4294967168 }
  0x41   : > { %806 = dma.done.wait (%p917_p1), [#allocation6], 256  }
  0x42   : > { %808 = vsyncadd (%p917_p1), [#allocation6], 4294967040  ;;  %v845_v0 = vmov 0.0   ;;  %vm846_vm0 = vmmov 0   ;;  %v669_v1 = vld [vmem:[#allocation5 + $0x8] sm:$0xff]   ;;  %v670_v2 = vld [vmem:[#allocation5] sm:$0xff]  }
  0x43   : > { %570 = vmatprep.subr.bf16.mxu0 %v845_v0  ;;  %574 = vmatprep.mubr.msk.bf16.mxu0 %vm846_vm0, %v845_v0  ;;  %v259_v3 = vld [vmem:[%s224_s30] sm:$0xff]  ;;  %vm284_vm1 = vcmask 261120   ;;  %s543_s23 = sshll.u32 %s998_s12, 4  ;;  %vm329_vm2 = vcmask 60416   ;;  %s847_s27 = smov 88  }
  0x44   : > { %571 = vmatpush3.bf16.msra.mxu0 %v669_v1  ;;  %v260_v4 = vpack.c.bf16 %v259_v3, %v259_v3  ;;  %v545_v5 = vld [vmem:[%s1130_s2] ss:$0 sm:$0xff]  ;;  %s848_s6 = smov 96   ;;  %s1014_s7 = scalar_lea.vmem [#allocation7], %s543_s23 }
  0x45   : > { %572 = vmatprep.subr.bf16.mxu0 %v845_v0  ;;  %s849_s8 = smov 112   ;;  %s850_s9 = smov 120  }
  0x46   : > { %s851_s24 = smov 104   ;;  %s852_s10 = smov 80  }
  0x47   : > { %s853_s14 = smov 72   ;;  %s1018_s11 = scalar_lea.vmem [#allocation8], %s543_s23 }
  0x48   : > { %573 = vmatpush3.bf16.msra.mxu0 %v670_v2  ;;  %s388_s29 = sshll.u32 %s1014_s7, 4  ;;  %s565_s21 = sshll.u32 %s831_s18, 8  ;;  %s1027_s29 = int_to_ptr.vmem [resolvable:$true] %s388_s29 }
  0x49   : > { %s405_s22 = sshll.u32 %s1018_s11, 4  ;;  %s1038_s25 = scalar_lea.hbm %s1131_s3, %s565_s21  ;;  %s1040_s22 = int_to_ptr.vmem [resolvable:$true] %s405_s22 }
  0x4a   : > { %s369_s23 = scalar_lea.sflag [#allocation4], %s998_s12 }
  0x4b   : > { %575 = vmatmul.mubr.msk.bf16.vlgmr.msra.gmra.mxu0 %vm284_vm1, %v260_v4 }
 0x10b   : > { %v322_v6 = vpop.f32.mrf.mxu0 }
 0x10c   : > { %v323_v7 = vadd.f32 %v545_v5, %v322_v6 }
 0x10d   : > { %v576_v8 = vpop.f32.mrf.mxu0 }
 0x10e   : > { %v328_v9 = vpack.c.bf16 %v323_v7, %v323_v7 }
 0x10f   : > { %v325_v10 = vpop.f32.mrf.mxu0 }
 0x110   : > { %343 = vrot.lane.b32.xlu1 %v328_v9, %s847_s27  ;;  %334 = vrot.lane.b32.xlu0 %v328_v9, %s848_s6  ;;  %330 = vst.msk [vmem:[%s1014_s7] sm:$0xf] %vm329_vm2, %v328_v9  ;;  %s725_s27 = scalar_lea.vmem %s1027_s29, 256  ;;  %s854_s6 = smov [#allocation7]  }
 0x111   : > { %v577_v11 = vpop.f32.mrf.mxu0  ;;  %p726_p1 = scmp.ne.s32.totalorder %s1027_s29, %s725_s27 }
 0x113   : > { %p727_p8 = pnand %p726_p1, %p970_p13 }
 0x114   : > { %348 = vrot.lane.b32.xlu1 %v328_v9, %s849_s8  ;;  %338 = vrot.lane.b32.xlu0 %v328_v9, %s850_s9  ;;  %s729_s8 = sshll.u32 %s854_s6, 4  ;;  %s730_s8 = int_to_ptr.vmem [resolvable:$false] %s729_s8 }
 0x115   : > { %p728_p10 = pneg %p727_p8  ;;  %s731_s9 = scalar_lea.vmem %s730_s8, 512 }
 0x116   : > { %p732_p0 = scmp.lt.s32.totalorder %s1027_s29, %s730_s8  ;;  %p733_p2 = scmp.lt.s32.totalorder %s731_s9, %s725_s27 }
 0x118   : > { %358 = vrot.lane.b32.xlu1 %v328_v9, %s851_s24  ;;  %353 = vrot.lane.b32.xlu0 %v328_v9, %s852_s10  ;;  %p734_p3 = por %p733_p2, %p732_p0 }
 0x11a   : > { %p735_p5 = pnand %p734_p3, %p728_p10 }
 0x11c   : > { %363 = vrot.lane.b32.xlu0 %v328_v9, %s853_s14 }
 0x182   : > { %v344_v12 = vpop.permute.xlu1 %343  ;;  %v335_v13 = vpop.permute.xlu0 %334 }
 0x183   : > { %551 = vst.msk [vmem:[%s1018_s11 + $0x4] sm:$0xf] %vm329_vm2, %v344_v12  ;;  %337 = vst.msk [vmem:[%s1018_s11] sm:$0xf] %vm329_vm2, %v335_v13 }
 0x186   : > { %v349_v14 = vpop.permute.xlu1 %348  ;;  %v339_v15 = vpop.permute.xlu0 %338 }
 0x187   : > { %552 = vst.msk [vmem:[%s1014_s7 + $0x8] sm:$0xf] %vm329_vm2, %v349_v14  ;;  %550 = vst.msk [vmem:[%s1014_s7 + $0x4] sm:$0xf] %vm329_vm2, %v339_v15 }
 0x18a   : > { %v359_v16 = vpop.permute.xlu1 %358  ;;  %v354_v17 = vpop.permute.xlu0 %353 }
 0x18b   : > { %554 = vst.msk [vmem:[%s1014_s7 + $0xc] sm:$0xf] %vm329_vm2, %v359_v16  ;;  %553 = vst.msk [vmem:[%s1018_s11 + $0x8] sm:$0xf] %vm329_vm2, %v354_v17 }
 0x18c   : > { %738 = shalt.err (!%p735_p5)
}
 0x18d   : > { %s739_s7 = scalar_lea.hbm %s1038_s25, 256  ;;  %s743_s14 = scalar_lea.hbm %s1131_s3, 512 }
 0x18e   : > { %p740_p7 = scmp.ne.s32.totalorder %s1038_s25, %s739_s7  ;;  %p744_p9 = scmp.lt.s32.totalorder %s1038_s25, %s1131_s3 }
 0x18f   : > { %p745_p11 = scmp.lt.s32.totalorder %s743_s14, %s739_s7 }
 0x190   : > { %p741_p6 = pnand %p740_p7, %p970_p13 }
 0x191   : > { %p746_p12 = por %p745_p11, %p744_p9 }
 0x192   : > { %p742_p4 = pneg %p741_p6 }
 0x194   : > { %p747_p1 = pnand %p746_p12, %p742_p4 }
 0x196   : > { %750 = shalt.err (!%p747_p1)
}
 0x197   : > { %s855_s27 = smov 64   ;;  %s856_s6 = smov 4   ;;  %v364_v18 = vpop.permute.xlu0 %363 }
 0x198   : > { %584 = dma.vmem_to_hbm [thread:$0]  (%p970_p13), %s1027_s29, 256, %s1038_s25, %s369_s23, %s855_s27, %s855_s27, %s856_s6  }
 0x199   : > { %s1077_s7 = scalar_lea.hbm %s1132_s4, %s565_s21  ;;  %555 = vst.msk [vmem:[%s1018_s11 + $0xc] sm:$0xf] %vm329_vm2, %v364_v18  ;;  %s374_s24 = scalar_lea.sflag [#allocation9], %s998_s12 }
 0x19a   : > { %s751_s10 = scalar_lea.vmem %s1040_s22, 256  ;;  %s857_s14 = smov [#allocation8]  }
 0x19b   : > { %p752_p8 = scmp.ne.s32.totalorder %s1040_s22, %s751_s10  ;;  %s755_s30 = sshll.u32 %s857_s14, 4  ;;  %s756_s30 = int_to_ptr.vmem [resolvable:$false] %s755_s30 }
 0x19c   : > { %s757_s1 = scalar_lea.vmem %s756_s30, 512  ;;  %p758_p2 = scmp.lt.s32.totalorder %s1040_s22, %s756_s30 }
 0x19d   : > { %p753_p10 = pnand %p752_p8, %p970_p13  ;;  %p759_p3 = scmp.lt.s32.totalorder %s757_s1, %s751_s10 }
 0x19f   : > { %p754_p0 = pneg %p753_p10  ;;  %p760_p5 = por %p759_p3, %p758_p2 }
 0x1a1   : > { %p761_p7 = pnand %p760_p5, %p754_p0 }
 0x1a3   : > { %764 = shalt.err (!%p761_p7)
}
 0x1a4   : > { %s765_s18 = scalar_lea.hbm %s1077_s7, 256  ;;  %s769_s29 = scalar_lea.hbm %s1132_s4, 512 }
 0x1a5   : > { %p766_p6 = scmp.ne.s32.totalorder %s1077_s7, %s765_s18  ;;  %p770_p11 = scmp.lt.s32.totalorder %s1077_s7, %s1132_s4 }
 0x1a6   : > { %p771_p12 = scmp.lt.s32.totalorder %s769_s29, %s765_s18 }
 0x1a7   : > { %p767_p4 = pnand %p766_p6, %p970_p13 }
 0x1a8   : > { %p772_p1 = por %p771_p12, %p770_p11 }
 0x1a9   : > { %p768_p9 = pneg %p767_p4 }
 0x1ab   : > { %p773_p8 = pnand %p772_p1, %p768_p9 }
 0x1ad   : > { %776 = shalt.err (!%p773_p8)
}
 0x1ae   : > { %585 = dma.vmem_to_hbm [thread:$0]  (%p970_p13), %s1040_s22, 256, %s1077_s7, %s374_s24, %s855_s27, %s855_s27, %s856_s6  }
 0x1af PF: > { %s420_s23 = sand.u32 1, %s819_s15   ;;  %p1146_p10 = scmp.ne.s32.totalorder %s1138_s26, 0 }
 0x1b0   : > { %p1147_p0 = scmp.ge.s32.totalorder %s839_s20, 2  ;;  %s421_s8 = scalar_lea.sflag [#allocation4], %s420_s23 }
 0x1b2   : > { %p597_p2 = pnand %p1147_p0, %p1146_p10 }
 0x1b4   : > { %p598_p3 = pneg %p597_p2 }
 0x1b6   : > { %810 = dma.done.wait (%p598_p3), %s421_s8, 256  }
 0x1b7   : > { %812 = vsyncadd (%p598_p3), %s421_s8, 4294967040  ;;  %s430_s9 = scalar_lea.sflag [#allocation9], %s420_s23 }
 0x1b8   : > { %814 = dma.done.wait (%p598_p3), %s430_s9, 256  }
 0x1b9   : > { %816 = vsyncadd (%p598_p3), %s430_s9, 4294967040  ;;  %s25_s20 = sadd.s32 1, %s839_s20   ;;  %s1148_s15 = smov %s823_s16 }
 0x1ba   : > { %p22_p5 = scmp.ge.s32.totalorder %s25_s20, 4   ;;  %s1149_s16 = smov %s827_s17 }
 0x1bb   : > { %s1150_s17 = smov %s979_s28  ;;  %s1151_s18 = smov %s835_s19 }
 0x1bc   : > { %s1152_s19 = smov %s1154_s5  ;;  %24 = sbr.rel (!%p22_p5) target bundleno = 11 (0xb), region = 104 }
 0x1c1   :  { %435 = vsyncpa [#allocation3], 1 }
 0x1c2   :  { %437 = vsyncpa [#allocation3 + $0x1], 1 }
 0x1c3   :  { %438 = vsyncpa [#allocation6], 1 }
 0x1c4   :  { %439 = vsyncpa [#allocation4], 1 }
 0x1c5   :  { %441 = vsyncpa [#allocation4 + $0x1], 1 }
 0x1c6   :  { %442 = vsyncpa [#allocation9], 1 }
 0x1c7   :  { %444 = vsyncpa [#allocation9 + $0x1], 1 }

</bundles_post_ra>
